<compile_context>
chip_gen: v6e
topology: v6e:2x2x1
jax: 0.10.0
libtpu: 0.0.40
codegen_flags: <defaults>
</compile_context>

<pallas_src>
import jax
import jax.numpy as jnp
from jax.experimental import pallas as pl
from jax.experimental.pallas import tpu as pltpu

LANE = 128      # TPU lane width: keep feature dims lane-dense multiples of 128.
SUBLANE = 8     # sublane quantum for f32/bf16 batch tiles.


def _round_up(n, m):
    return (n + m - 1) // m * m


def _pad2d(a, rows, cols):
    r, c = a.shape
    return jnp.pad(a, ((0, rows - r), (0, cols - c)))


# --------------------------------------------------------------------------- #
# Kernel: one batch tile per grid step.  Weights (bf16) stay resident in VMEM;
# all four matmuls accumulate in f32 on the MXU.
# --------------------------------------------------------------------------- #
def vil_kernel(x_ref, wt_ref, bt_ref, wi_ref, bi_ref,
               w1_ref, b1_ref, w2_ref, b2_ref,
               logits_ref, recon_ref):
    x = x_ref[...]                                                # [BB, Tp] bf16

    # --- transform_layer: time domain -> transform domain -------------------
    z = jnp.dot(x, wt_ref[...], preferred_element_type=jnp.float32) + bt_ref[...]

    # --- invert_transform_layer: transform domain -> time domain ------------
    recon = jnp.dot(z.astype(jnp.bfloat16), wi_ref[...],
                    preferred_element_type=jnp.float32) + bi_ref[...]
    recon_ref[...] = recon.astype(recon_ref.dtype)                # reconstructed_audio

    # --- existing_model: Linear -> ReLU -> Linear ----------------------------
    h = jnp.dot(recon.astype(jnp.bfloat16), w1_ref[...],
                preferred_element_type=jnp.float32) + b1_ref[...]
    h = jnp.maximum(h, 0.0)
    logits = jnp.dot(h.astype(jnp.bfloat16), w2_ref[...],
                     preferred_element_type=jnp.float32) + b2_ref[...]
    logits_ref[...] = logits.astype(logits_ref.dtype)             # lane-dense [BB, Cp]


# --------------------------------------------------------------------------- #
# Parameter prep (done once, off the hot path): zero-pad to lane-aligned
# shapes, cast weights to bf16, keep biases f32 as [1, out].
# Zero padding is exact: padded rows/cols contribute 0, so slicing the outputs
# recovers the unpadded math bit-for-bit (modulo bf16 rounding of real weights).
# --------------------------------------------------------------------------- #
def prepare_params(params):
    wt, bt, wi, bi, w1, b1, w2, b2 = params
    T, F_dim = wt.shape
    H = w1.shape[1]
    C = w2.shape[1]
    Tp, Fp, Hp, Cp = (_round_up(d, LANE) for d in (T, F_dim, H, C))

    def prep(w, b, rin, cout):
        return (_pad2d(w, rin, cout).astype(jnp.bfloat16),
                _pad2d(b, 1, cout).astype(jnp.float32))

    wt_p, bt_p = prep(wt, bt, Tp, Fp)      # transform_layer:        Linear(T -> F)
    wi_p, bi_p = prep(wi, bi, Fp, Tp)      # invert_transform_layer: Linear(F -> T)
    w1_p, b1_p = prep(w1, b1, Tp, Hp)      # existing_model layer 1: Linear(T -> H)
    w2_p, b2_p = prep(w2, b2, Hp, Cp)      # existing_model layer 2: Linear(H -> C)
    return (wt_p, bt_p, wi_p, bi_p, w1_p, b1_p, w2_p, b2_p)


# --------------------------------------------------------------------------- #
# Wrapper: pads x, sets up batch grid + BlockSpecs, slices padded outputs.
# Returns (logits [B, C], reconstructed_audio [B, T]).
# --------------------------------------------------------------------------- #
def vil_forward(x, padded_params, num_classes):
    B, T = x.shape
    wt, bt, wi, bi, w1, b1, w2, b2 = padded_params
    Tp, Fp = wt.shape
    Hp, Cp = w2.shape

    # Batch tiling: at least one full sublane, at most 128 MXU rows per tile.
    # The batch grid axis is "parallel" so v7x's two TensorCores split it.
    BB = min(_round_up(max(B, SUBLANE), SUBLANE), 128)
    Bp = _round_up(B, BB)
    x_p = jnp.pad(x, ((0, Bp - B), (0, Tp - T))).astype(jnp.bfloat16)

    grid = (Bp // BB,)

    def batch_map(i):
        return (i, 0)

    def resident_map(i):          # weights/biases: same block every step → stay in VMEM
        return (0, 0)

    in_specs = [
        pl.BlockSpec((BB, Tp), batch_map),        # x tile
        pl.BlockSpec((Tp, Fp), resident_map),     # wt
        pl.BlockSpec((1, Fp), resident_map),      # bt
        pl.BlockSpec((Fp, Tp), resident_map),     # wi
        pl.BlockSpec((1, Tp), resident_map),      # bi
        pl.BlockSpec((Tp, Hp), resident_map),     # w1
        pl.BlockSpec((1, Hp), resident_map),      # b1
        pl.BlockSpec((Hp, Cp), resident_map),     # w2
        pl.BlockSpec((1, Cp), resident_map),      # b2
    ]
    out_specs = (
        pl.BlockSpec((BB, Cp), batch_map),        # logits (lane-dense: Cp multiple of 128)
        pl.BlockSpec((BB, Tp), batch_map),        # reconstructed audio
    )

    flops = 2 * Bp * (Tp * Fp + Fp * Tp + Tp * Hp + Hp * Cp)
    weight_bytes = sum(int(p.size) * p.dtype.itemsize for p in padded_params)
    io_bytes = x_p.size * 2 + Bp * Cp * 4 + Bp * Tp * 4
    cost = pl.CostEstimate(flops=flops, transcendentals=0,
                           bytes_accessed=weight_bytes + io_bytes)

    # VMEM budget: resident weights + double-buffered batch tiles + headroom.
    # Clamp under v7x's 64 MiB per-TC physical capacity.
    tile_bytes = BB * Tp * 2 + BB * Cp * 4 + BB * Tp * 4
    vmem_need = weight_bytes + 2 * tile_bytes + (4 << 20)
    vmem_limit = int(min(max(vmem_need, 32 << 20), 60 << 20))

    # TODO(synk): for realistic audio lengths (T, F in the thousands) add a
    # reduction grid axis (marked "arbitrary", last) over T/F with a VMEM f32
    # accumulator so weight tiles double-buffer inside v7x's 64 MiB budget.
    logits_p, recon_p = pl.pallas_call(
        vil_kernel,
        out_shape=(
            jax.ShapeDtypeStruct((Bp, Cp), jnp.float32),
            jax.ShapeDtypeStruct((Bp, Tp), jnp.float32),
        ),
        grid=grid,
        in_specs=in_specs,
        out_specs=out_specs,
        compiler_params=pltpu.CompilerParams(
            dimension_semantics=("parallel",),
            vmem_limit_bytes=vmem_limit),
        cost_estimate=cost,
    )(x_p, *padded_params)

    return logits_p[:B, :num_classes], recon_p[:B, :T]


# --------------------------------------------------------------------------- #
# Init + references
# --------------------------------------------------------------------------- #
def init_params(key, T, F_dim, H, C):
    """nn.Linear-style init (uniform ±1/sqrt(fan_in)); weights as [in, out]."""
    ks = jax.random.split(key, 8)

    def lin(kw, kb, fan_in, fan_out):
        bound = 1.0 / jnp.sqrt(fan_in)
        w = jax.random.uniform(kw, (fan_in, fan_out), jnp.float32, -bound, bound)
        b = jax.random.uniform(kb, (1, fan_out), jnp.float32, -bound, bound)
        return w, b

    wt, bt = lin(ks[0], ks[1], T, F_dim)
    wi, bi = lin(ks[2], ks[3], F_dim, T)
    w1, b1 = lin(ks[4], ks[5], T, H)
    w2, b2 = lin(ks[6], ks[7], H, C)
    return (wt, bt, wi, bi, w1, b1, w2, b2)


def vil_reference_bf16(x, padded_params, num_classes):
    """Pure-JAX reference mirroring the kernel's bf16-input / f32-accum math."""
    wt, bt, wi, bi, w1, b1, w2, b2 = padded_params
    T = x.shape[1]
    xp = jnp.pad(x, ((0, 0), (0, wt.shape[0] - T))).astype(jnp.bfloat16)
    z = jnp.dot(xp, wt, preferred_element_type=jnp.float32) + bt
    recon = jnp.dot(z.astype(jnp.bfloat16), wi, preferred_element_type=jnp.float32) + bi
    h = jnp.maximum(jnp.dot(recon.astype(jnp.bfloat16), w1,
                            preferred_element_type=jnp.float32) + b1, 0.0)
    logits = jnp.dot(h.astype(jnp.bfloat16), w2,
                     preferred_element_type=jnp.float32) + b2
    return logits[:, :num_classes], recon[:, :T]


def vil_reference_f32(x, params):
    """Original full-f32 module semantics (loose sanity check vs bf16 weights)."""
    wt, bt, wi, bi, w1, b1, w2, b2 = params
    z = x @ wt + bt
    recon = z @ wi + bi
    h = jnp.maximum(recon @ w1 + b1, 0.0)
    logits = h @ w2 + b2
    return logits, recon


if __name__ == "__main__":
    B, T = 2, 64        # batch, time-samples
    F_dim = 64          # transform-domain size (e.g. frequency bins)
    H, C = 32, 10       # existing_model hidden width / num classes

    key = jax.random.PRNGKey(0)
    kx, kp = jax.random.split(key)
    x = jax.random.normal(kx, (B, T), jnp.float32)
    params_f32 = init_params(kp, T, F_dim, H, C)
    padded_params = prepare_params(params_f32)

    logits, recon = jax.block_until_ready(vil_forward(x, padded_params, C))

    assert logits.shape == (B, C) and recon.shape == (B, T)

    # Tight check against a reference doing the identical bf16/f32-accum math.
    ref_logits, ref_recon = vil_reference_bf16(x, padded_params, C)
    assert jnp.allclose(logits, ref_logits, atol=2e-3, rtol=2e-3)
    assert jnp.allclose(recon, ref_recon, atol=2e-3, rtol=2e-3)

    # Loose semantic check against the original f32 module (bf16 weight noise).
    f32_logits, f32_recon = vil_reference_f32(x, params_f32)
    assert jnp.allclose(logits, f32_logits, atol=5e-2, rtol=5e-2)
    assert jnp.allclose(recon, f32_recon, atol=5e-2, rtol=5e-2)

    print("KERNEL_OK")
</pallas_src>

<mosaic_0001>
module attributes {stable_mosaic.version = 11 : i64} {
  func.func @vil_kernel(%arg0: i32, %arg1: memref<8x128xbf16, #tpu.memory_space<vmem>>, %arg2: memref<128x128xbf16, #tpu.memory_space<vmem>>, %arg3: memref<1x128xf32, #tpu.memory_space<vmem>>, %arg4: memref<128x128xbf16, #tpu.memory_space<vmem>>, %arg5: memref<1x128xf32, #tpu.memory_space<vmem>>, %arg6: memref<128x128xbf16, #tpu.memory_space<vmem>>, %arg7: memref<1x128xf32, #tpu.memory_space<vmem>>, %arg8: memref<128x128xbf16, #tpu.memory_space<vmem>>, %arg9: memref<1x128xf32, #tpu.memory_space<vmem>>, %arg10: memref<8x128xf32, #tpu.memory_space<vmem>>, %arg11: memref<8x128xf32, #tpu.memory_space<vmem>>) attributes {dimension_semantics = [#tpu.dimension_semantics<parallel>], iteration_bounds = array<i64: 1>, scalar_prefetch = 0 : i64, scratch_operands = 0 : i64, tpu.core_type = #tpu.core_type<tc>, window_params = [{transform_indices = @transform_0, window_bounds = array<i64: 8, 128>}, {pipeline_mode = #tpu.pipeline_mode<synchronous>, transform_indices = @transform_1, window_bounds = array<i64: 128, 128>}, {pipeline_mode = #tpu.pipeline_mode<synchronous>, transform_indices = @transform_2, window_bounds = array<i64: 1, 128>}, {pipeline_mode = #tpu.pipeline_mode<synchronous>, transform_indices = @transform_3, window_bounds = array<i64: 128, 128>}, {pipeline_mode = #tpu.pipeline_mode<synchronous>, transform_indices = @transform_4, window_bounds = array<i64: 1, 128>}, {pipeline_mode = #tpu.pipeline_mode<synchronous>, transform_indices = @transform_5, window_bounds = array<i64: 128, 128>}, {pipeline_mode = #tpu.pipeline_mode<synchronous>, transform_indices = @transform_6, window_bounds = array<i64: 1, 128>}, {pipeline_mode = #tpu.pipeline_mode<synchronous>, transform_indices = @transform_7, window_bounds = array<i64: 128, 128>}, {pipeline_mode = #tpu.pipeline_mode<synchronous>, transform_indices = @transform_8, window_bounds = array<i64: 1, 128>}, {transform_indices = @transform_9, window_bounds = array<i64: 8, 128>}, {transform_indices = @transform_10, window_bounds = array<i64: 8, 128>}]} {
    %c0 = arith.constant 0 : index
    %c0_0 = arith.constant 0 : index
    %0 = vector.load %arg1[%c0, %c0_0] : memref<8x128xbf16, #tpu.memory_space<vmem>>, vector<8x128xbf16>
    %c0_1 = arith.constant 0 : index
    %c0_2 = arith.constant 0 : index
    %1 = vector.load %arg2[%c0_1, %c0_2] : memref<128x128xbf16, #tpu.memory_space<vmem>>, vector<128x128xbf16>
    %cst = arith.constant dense<0.000000e+00> : vector<8x128xf32>
    %2 = tpu.matmul %0, %1, %cst {dimension_numbers = #tpu.dot_dimension_numbers<[1], [0], [0], [1], [0, 0, 1, 1], [], []>} : vector<8x128xbf16>, vector<128x128xbf16>, vector<8x128xf32> -> vector<8x128xf32>
    %c0_3 = arith.constant 0 : index
    %c0_4 = arith.constant 0 : index
    %3 = vector.load %arg3[%c0_3, %c0_4] : memref<1x128xf32, #tpu.memory_space<vmem>>, vector<1x128xf32>
    %4 = vector.broadcast %3 : vector<1x128xf32> to vector<8x128xf32>
    %5 = arith.addf %2, %4 : vector<8x128xf32>
    %6 = arith.truncf %5 : vector<8x128xf32> to vector<8x128xbf16>
    %c0_5 = arith.constant 0 : index
    %c0_6 = arith.constant 0 : index
    %7 = vector.load %arg4[%c0_5, %c0_6] : memref<128x128xbf16, #tpu.memory_space<vmem>>, vector<128x128xbf16>
    %cst_7 = arith.constant dense<0.000000e+00> : vector<8x128xf32>
    %8 = tpu.matmul %6, %7, %cst_7 {dimension_numbers = #tpu.dot_dimension_numbers<[1], [0], [0], [1], [0, 0, 1, 1], [], []>} : vector<8x128xbf16>, vector<128x128xbf16>, vector<8x128xf32> -> vector<8x128xf32>
    %c0_8 = arith.constant 0 : index
    %c0_9 = arith.constant 0 : index
    %9 = vector.load %arg5[%c0_8, %c0_9] : memref<1x128xf32, #tpu.memory_space<vmem>>, vector<1x128xf32>
    %10 = vector.broadcast %9 : vector<1x128xf32> to vector<8x128xf32>
    %11 = arith.addf %8, %10 : vector<8x128xf32>
    %c0_10 = arith.constant 0 : index
    %c0_11 = arith.constant 0 : index
    %12 = vector.load %arg11[%c0_10, %c0_11] : memref<8x128xf32, #tpu.memory_space<vmem>>, vector<8x128xf32>
    tpu.vector_store %arg11[%c0_10, %c0_11], %11 {strides = array<i32>} : memref<8x128xf32, #tpu.memory_space<vmem>>, vector<8x128xf32>,
    %13 = arith.truncf %11 : vector<8x128xf32> to vector<8x128xbf16>
    %c0_12 = arith.constant 0 : index
    %c0_13 = arith.constant 0 : index
    %14 = vector.load %arg6[%c0_12, %c0_13] : memref<128x128xbf16, #tpu.memory_space<vmem>>, vector<128x128xbf16>
    %cst_14 = arith.constant dense<0.000000e+00> : vector<8x128xf32>
    %15 = tpu.matmul %13, %14, %cst_14 {dimension_numbers = #tpu.dot_dimension_numbers<[1], [0], [0], [1], [0, 0, 1, 1], [], []>} : vector<8x128xbf16>, vector<128x128xbf16>, vector<8x128xf32> -> vector<8x128xf32>
    %c0_15 = arith.constant 0 : index
    %c0_16 = arith.constant 0 : index
    %16 = vector.load %arg7[%c0_15, %c0_16] : memref<1x128xf32, #tpu.memory_space<vmem>>, vector<1x128xf32>
    %17 = vector.broadcast %16 : vector<1x128xf32> to vector<8x128xf32>
    %18 = arith.addf %15, %17 : vector<8x128xf32>
    %cst_17 = arith.constant 0.000000e+00 : f32
    %19 = vector.broadcast %cst_17 : f32 to vector<8x128xf32>
    %20 = arith.maximumf %18, %19 : vector<8x128xf32>
    %21 = arith.truncf %20 : vector<8x128xf32> to vector<8x128xbf16>
    %c0_18 = arith.constant 0 : index
    %c0_19 = arith.constant 0 : index
    %22 = vector.load %arg8[%c0_18, %c0_19] : memref<128x128xbf16, #tpu.memory_space<vmem>>, vector<128x128xbf16>
    %cst_20 = arith.constant dense<0.000000e+00> : vector<8x128xf32>
    %23 = tpu.matmul %21, %22, %cst_20 {dimension_numbers = #tpu.dot_dimension_numbers<[1], [0], [0], [1], [0, 0, 1, 1], [], []>} : vector<8x128xbf16>, vector<128x128xbf16>, vector<8x128xf32> -> vector<8x128xf32>
    %c0_21 = arith.constant 0 : index
    %c0_22 = arith.constant 0 : index
    %24 = vector.load %arg9[%c0_21, %c0_22] : memref<1x128xf32, #tpu.memory_space<vmem>>, vector<1x128xf32>
    %25 = vector.broadcast %24 : vector<1x128xf32> to vector<8x128xf32>
    %26 = arith.addf %23, %25 : vector<8x128xf32>
    %c0_23 = arith.constant 0 : index
    %c0_24 = arith.constant 0 : index
    %27 = vector.load %arg10[%c0_23, %c0_24] : memref<8x128xf32, #tpu.memory_space<vmem>>, vector<8x128xf32>
    tpu.vector_store %arg10[%c0_23, %c0_24], %26 {strides = array<i32>} : memref<8x128xf32, #tpu.memory_space<vmem>>, vector<8x128xf32>,
    return
  }
  func.func @transform_0(%arg0: i32) -> (i32, i32) {
    %c0_i32 = arith.constant 0 : i32
    %c0_i32_0 = arith.constant 0 : i32
    return %arg0, %c0_i32 : i32, i32
  }
  func.func @transform_1(%arg0: i32) -> (i32, i32) {
    %c0_i32 = arith.constant 0 : i32
    %c0_i32_0 = arith.constant 0 : i32
    %c0_i32_1 = arith.constant 0 : i32
    return %c0_i32, %c0_i32_0 : i32, i32
  }
  func.func @transform_2(%arg0: i32) -> (i32, i32) {
    %c0_i32 = arith.constant 0 : i32
    %c0_i32_0 = arith.constant 0 : i32
    %c0_i32_1 = arith.constant 0 : i32
    return %c0_i32, %c0_i32_0 : i32, i32
  }
  func.func @transform_3(%arg0: i32) -> (i32, i32) {
    %c0_i32 = arith.constant 0 : i32
    %c0_i32_0 = arith.constant 0 : i32
    %c0_i32_1 = arith.constant 0 : i32
    return %c0_i32, %c0_i32_0 : i32, i32
  }
  func.func @transform_4(%arg0: i32) -> (i32, i32) {
    %c0_i32 = arith.constant 0 : i32
    %c0_i32_0 = arith.constant 0 : i32
    %c0_i32_1 = arith.constant 0 : i32
    return %c0_i32, %c0_i32_0 : i32, i32
  }
  func.func @transform_5(%arg0: i32) -> (i32, i32) {
    %c0_i32 = arith.constant 0 : i32
    %c0_i32_0 = arith.constant 0 : i32
    %c0_i32_1 = arith.constant 0 : i32
    return %c0_i32, %c0_i32_0 : i32, i32
  }
  func.func @transform_6(%arg0: i32) -> (i32, i32) {
    %c0_i32 = arith.constant 0 : i32
    %c0_i32_0 = arith.constant 0 : i32
    %c0_i32_1 = arith.constant 0 : i32
    return %c0_i32, %c0_i32_0 : i32, i32
  }
  func.func @transform_7(%arg0: i32) -> (i32, i32) {
    %c0_i32 = arith.constant 0 : i32
    %c0_i32_0 = arith.constant 0 : i32
    %c0_i32_1 = arith.constant 0 : i32
    return %c0_i32, %c0_i32_0 : i32, i32
  }
  func.func @transform_8(%arg0: i32) -> (i32, i32) {
    %c0_i32 = arith.constant 0 : i32
    %c0_i32_0 = arith.constant 0 : i32
    %c0_i32_1 = arith.constant 0 : i32
    return %c0_i32, %c0_i32_0 : i32, i32
  }
  func.func @transform_9(%arg0: i32) -> (i32, i32) {
    %c0_i32 = arith.constant 0 : i32
    %c0_i32_0 = arith.constant 0 : i32
    return %arg0, %c0_i32 : i32, i32
  }
  func.func @transform_10(%arg0: i32) -> (i32, i32) {
    %c0_i32 = arith.constant 0 : i32
    %c0_i32_0 = arith.constant 0 : i32
    return %arg0, %c0_i32 : i32, i32
  }
}

</mosaic_0001>

<bundles_post_ra>
// kernel: tpu_custom_call.1
= control target key start
LH: loop header
LB: loop body
LE: loop exit
PB: predicated region body
PF: predicated region fallthrough
CT: control target
= control target key end

     0   :  { %16 = vsyncpa [#allocation3], 0  ;;  %s1081_s0 = inlined_call_operand.hbm [shape: bf16[8,128], index: 0, kind: input, shape index: {}]   ;;  %s1082_s1 = inlined_call_operand.hbm [shape: bf16[128,128], index: 1, kind: input, shape index: {}]   ;;  %s1083_s2 = inlined_call_operand.vmem [shape: f32[1,128], index: 2, kind: input, shape index: {}]   ;;  %s1084_s3 = inlined_call_operand.hbm [shape: bf16[128,128], index: 3, kind: input, shape index: {}]   ;;  %s1085_s4 = inlined_call_operand.vmem [shape: f32[1,128], index: 4, kind: input, shape index: {}]   ;;  %s1086_s5 = inlined_call_operand.hbm [shape: bf16[128,128], index: 5, kind: input, shape index: {}]   ;;  %s1087_s6 = inlined_call_operand.vmem [shape: f32[1,128], index: 6, kind: input, shape index: {}]   ;;  %s1088_s7 = inlined_call_operand.hbm [shape: bf16[128,128], index: 7, kind: input, shape index: {}]   ;;  %s1089_s8 = inlined_call_operand.vmem [shape: f32[1,128], index: 8, kind: input, shape index: {}]   ;;  %s1090_s9 = inlined_call_operand.hbm [shape: f32[8,128], index: 9, kind: output, shape index: {0}]   ;;  %s1091_s10 = inlined_call_operand.hbm [shape: f32[8,128], index: 10, kind: output, shape index: {1}]  }
   0x1   :  { %17 = vsyncpa [#allocation6], 0 }
   0x2   :  { %18 = vsyncpa [#allocation9], 0 }
   0x3   :  { %19 = vsyncpa [#allocation4], 0 }
   0x4   :  { %20 = vsyncpa [#allocation13], 0  ;;  %s930_s13 = smov [#allocation5]  }
   0x5   :  { %s36_s14 = sshll.u32 %s930_s13, 4  ;;  %s37_s14 = int_to_ptr.vmem [resolvable:$true] %s36_s14 }
   0x6   :  { %s788_s15 = scalar_lea.vmem %s37_s14, 1024  ;;  %p793_p1 = scmp.lt.s32.totalorder %s37_s14, %s37_s14 }
   0x7   :  { %p789_p0 = scmp.ne.s32.totalorder %s37_s14, %s788_s15  ;;  %p794_p2 = scmp.lt.s32.totalorder %s788_s15, %s788_s15 }
   0x9   :  { %p795_p3 = por %p794_p2, %p793_p1 }
   0xb   :  { %p796_p4 = pnand %p795_p3, %p789_p0 }
   0xd   :  { %799 = shalt.err (!%p796_p4)
}
   0xe   :  { %s931_s16 = smov 64   ;;  %s932_s17 = smov 4  }
   0xf   :  { %42 = dma.hbm_to_vmem [thread:$0]  %s1082_s1, 1024, %s37_s14, [#allocation6], %s931_s16, %s931_s16, %s932_s17  }
  0x10   :  { %s933_s20 = smov [#allocation8]   ;;  %s934_s22 = smov [#allocation2]  }
  0x11   :  { %s64_s21 = sshll.u32 %s933_s20, 4  ;;  %s27_s23 = sshll.u32 %s934_s22, 4  ;;  %s65_s21 = int_to_ptr.vmem [resolvable:$true] %s64_s21  ;;  %s28_s23 = int_to_ptr.vmem [resolvable:$true] %s27_s23 }
  0x12   :  { %s808_s24 = scalar_lea.vmem %s65_s21, 1024  ;;  %p813_p6 = scmp.lt.s32.totalorder %s65_s21, %s65_s21 }
  0x13   :  { %p809_p5 = scmp.ne.s32.totalorder %s65_s21, %s808_s24  ;;  %p814_p7 = scmp.lt.s32.totalorder %s808_s24, %s808_s24 }
  0x15   :  { %p815_p8 = por %p814_p7, %p813_p6 }
  0x17   :  { %p816_p9 = pnand %p815_p8, %p809_p5 }
  0x19   :  { %819 = shalt.err (!%p816_p9)
}
  0x1a   :  { %70 = dma.hbm_to_vmem [thread:$0]  %s1086_s5, 1024, %s65_s21, [#allocation9], %s931_s16, %s931_s16, %s932_s17  }
  0x1b   :  { %s828_s1 = scalar_lea.vmem %s28_s23, 64  ;;  %p833_p11 = scmp.lt.s32.totalorder %s28_s23, %s28_s23 }
  0x1c   :  { %p829_p10 = scmp.ne.s32.totalorder %s28_s23, %s828_s1  ;;  %p834_p12 = scmp.lt.s32.totalorder %s828_s1, %s828_s1 }
  0x1e   :  { %p835_p13 = por %p834_p12, %p833_p11 }
  0x20   :  { %p836_p0 = pnand %p835_p13, %p829_p10 }
  0x22   :  { %839 = shalt.err (!%p836_p0)
}
  0x23   :  { %30 = dma.hbm_to_vmem [thread:$0]  %s1081_s0, 64, %s28_s23, [#allocation3]  }
  0x24   :  { %s935_s29 = smov [#allocation7]   ;;  %s936_s11 = smov [#allocation10]  }
  0x25   :  { %s50_s30 = sshll.u32 %s935_s29, 4  ;;  %s78_s12 = sshll.u32 %s936_s11, 4  ;;  %s51_s30 = int_to_ptr.vmem [resolvable:$true] %s50_s30  ;;  %s79_s12 = int_to_ptr.vmem [resolvable:$true] %s78_s12 }
  0x26   :  { %s848_s13 = scalar_lea.vmem %s51_s30, 1024  ;;  %p853_p2 = scmp.lt.s32.totalorder %s51_s30, %s51_s30 }
  0x27   :  { %p849_p1 = scmp.ne.s32.totalorder %s51_s30, %s848_s13  ;;  %p854_p3 = scmp.lt.s32.totalorder %s848_s13, %s848_s13 }
  0x29   :  { %p855_p4 = por %p854_p3, %p853_p2 }
  0x2b   :  { %p856_p5 = pnand %p855_p4, %p849_p1 }
  0x2d   :  { %859 = shalt.err (!%p856_p5)
}
  0x2e   :  { %56 = dma.hbm_to_vmem [thread:$0]  %s1084_s3, 1024, %s51_s30, [#allocation6], %s931_s16, %s931_s16, %s932_s17  }
  0x2f   :  { %s868_s0 = scalar_lea.vmem %s79_s12, 1024  ;;  %p873_p7 = scmp.lt.s32.totalorder %s79_s12, %s79_s12 }
  0x30   :  { %p869_p6 = scmp.ne.s32.totalorder %s79_s12, %s868_s0  ;;  %p874_p8 = scmp.lt.s32.totalorder %s868_s0, %s868_s0 }
  0x32   :  { %p875_p9 = por %p874_p8, %p873_p7 }
  0x34   :  { %p876_p10 = pnand %p875_p9, %p869_p6 }
  0x36   :  { %879 = shalt.err (!%p876_p10)
}
  0x37   :  { %84 = dma.hbm_to_vmem [thread:$0]  %s1088_s7, 1024, %s79_s12, [#allocation9], %s931_s16, %s931_s16, %s932_s17  }
  0x38   :  { %920 = dma.done.wait [#allocation3], 64  }
  0x39   :  { %921 = vsyncadd [#allocation3], 4294967232 }
  0x3a   :  { %922 = dma.done.wait [#allocation6], 2048  }
  0x3b   :  { %923 = vsyncadd [#allocation6], 4294965248 }
  0x3c   :  { %924 = dma.done.wait [#allocation9], 2048  }
  0x3d   :  { %925 = vsyncadd [#allocation9], 4294965248  ;;  %v937_v0 = vmov 0.0   ;;  %vm938_vm0 = vmmov 0   ;;  %v748_v1 = vld [vmem:[#allocation5 + $0x38] sm:$0xff]   ;;  %v749_v2 = vld [vmem:[#allocation5 + $0x30] sm:$0xff]  }
  0x3e   :  { %657 = vmatprep.subr.bf16.mxu0 %v937_v0  ;;  %673 = vmatprep.mubr.msk.bf16.mxu0 %vm938_vm0, %v937_v0  ;;  %v750_v3 = vld [vmem:[#allocation5 + $0x28] sm:$0xff]   ;;  %v756_v4 = vld [vmem:[#allocation7 + $0x38] sm:$0xff]   ;;  %v751_v5 = vld [vmem:[#allocation5 + $0x20] sm:$0xff]  }
  0x3f   :  { %677 = vmatprep.subr.bf16.mxu1 %v937_v0  ;;  %693 = vmatprep.mubr.msk.bf16.mxu1 %vm938_vm0, %v937_v0  ;;  %v757_v6 = vld [vmem:[#allocation7 + $0x30] sm:$0xff]   ;;  %v752_v7 = vld [vmem:[#allocation5 + $0x18] sm:$0xff]   ;;  %v758_v8 = vld [vmem:[#allocation7 + $0x28] sm:$0xff]  }
  0x40   :  { %658 = vmatpush3.bf16.msra.mxu0 %v748_v1  ;;  %678 = vmatpush3.bf16.msra.mxu1 %v756_v4  ;;  %v753_v9 = vld [vmem:[#allocation5 + $0x10] sm:$0xff]   ;;  %v759_v10 = vld [vmem:[#allocation7 + $0x20] sm:$0xff]   ;;  %v754_v11 = vld [vmem:[#allocation5 + $0x8] sm:$0xff]  }
  0x41   :  { %659 = vmatprep.subr.bf16.mxu0 %v937_v0  ;;  %679 = vmatprep.subr.bf16.mxu1 %v937_v0  ;;  %v760_v12 = vld [vmem:[#allocation7 + $0x18] sm:$0xff]   ;;  %v755_v13 = vld [vmem:[#allocation5] sm:$0xff]   ;;  %v761_v14 = vld [vmem:[#allocation7 + $0x10] sm:$0xff]  }
  0x42   :  { %v103_v15 = vld [vmem:[#allocation2] sm:$0xf]  ;;  %v762_v16 = vld [vmem:[#allocation7 + $0x8] sm:$0xff]   ;;  %v763_v17 = vld [vmem:[#allocation7] sm:$0xff]  }
  0x43   :  { %v764_v18 = vld [vmem:[#allocation8 + $0x38] sm:$0xff]   ;;  %v765_v19 = vld [vmem:[#allocation8 + $0x30] sm:$0xff]   ;;  %v766_v20 = vld [vmem:[#allocation8 + $0x28] sm:$0xff]  }
  0x44   :  { %660 = vmatpush3.bf16.msra.mxu0 %v749_v2  ;;  %680 = vmatpush3.bf16.msra.mxu1 %v757_v6  ;;  %v767_v21 = vld [vmem:[#allocation8 + $0x20] sm:$0xff]   ;;  %v768_v22 = vld [vmem:[#allocation8 + $0x18] sm:$0xff]   ;;  %v769_v23 = vld [vmem:[#allocation8 + $0x10] sm:$0xff]  }
  0x45   :  { %661 = vmatprep.subr.bf16.mxu0 %v937_v0  ;;  %681 = vmatprep.subr.bf16.mxu1 %v937_v0  ;;  %v770_v24 = vld [vmem:[#allocation8 + $0x8] sm:$0xff]   ;;  %v585_v25 = vld [vmem:[%s1083_s2] ss:$0 sm:$0xff]  ;;  %v771_v32 = vld [vmem:[#allocation8] sm:$0xff]  }
  0x46   :  { %v772_v33 = vld [vmem:[#allocation10 + $0x38] sm:$0xff]   ;;  %v773_v34 = vld [vmem:[#allocation10 + $0x30] sm:$0xff]   ;;  %v774_v35 = vld [vmem:[#allocation10 + $0x28] sm:$0xff]  }
  0x47   :  { %v775_v36 = vld [vmem:[#allocation10 + $0x20] sm:$0xff]   ;;  %v776_v37 = vld [vmem:[#allocation10 + $0x18] sm:$0xff]   ;;  %v777_v38 = vld [vmem:[#allocation10 + $0x10] sm:$0xff]  }
  0x48   :  { %662 = vmatpush3.bf16.msra.mxu0 %v750_v3  ;;  %682 = vmatpush3.bf16.msra.mxu1 %v758_v8  ;;  %v594_v39 = vld [vmem:[%s1085_s4] ss:$0 sm:$0xff]  ;;  %v778_v46 = vld [vmem:[#allocation10 + $0x8] sm:$0xff]   ;;  %v779_v47 = vld [vmem:[#allocation10] sm:$0xff]   ;;  %s939_s4 = smov [#allocation12]  }
  0x49   :  { %663 = vmatprep.subr.bf16.mxu0 %v937_v0  ;;  %683 = vmatprep.subr.bf16.mxu1 %v937_v0  ;;  %v603_v48 = vld [vmem:[%s1087_s6] ss:$0 sm:$0xff]  ;;  %s570_s20 = sshll.u32 %s939_s4, 4  ;;  %s571_s20 = int_to_ptr.vmem [resolvable:$true] %s570_s20 }
  0x4a   :  { %s880_s21 = scalar_lea.vmem %s571_s20, 128  ;;  %p885_p12 = scmp.lt.s32.totalorder %s571_s20, %s571_s20 }
  0x4b   :  { %p881_p11 = scmp.ne.s32.totalorder %s571_s20, %s880_s21  ;;  %p886_p13 = scmp.lt.s32.totalorder %s880_s21, %s880_s21 }
  0x4c   :  { %664 = vmatpush3.bf16.msra.mxu0 %v751_v5  ;;  %684 = vmatpush3.bf16.msra.mxu1 %v759_v10 }
  0x4d   :  { %665 = vmatprep.subr.bf16.mxu0 %v937_v0  ;;  %685 = vmatprep.subr.bf16.mxu1 %v937_v0  ;;  %p887_p0 = por %p886_p13, %p885_p12 }
  0x4f   :  { %p888_p1 = pnand %p887_p0, %p881_p11 }
  0x50   :  { %666 = vmatpush3.bf16.msra.mxu0 %v752_v7  ;;  %686 = vmatpush3.bf16.msra.mxu1 %v760_v12 }
  0x51   :  { %667 = vmatprep.subr.bf16.mxu0 %v937_v0  ;;  %687 = vmatprep.subr.bf16.mxu1 %v937_v0 }
  0x54   :  { %668 = vmatpush3.bf16.msra.mxu0 %v753_v9  ;;  %688 = vmatpush3.bf16.msra.mxu1 %v761_v14 }
  0x55   :  { %669 = vmatprep.subr.bf16.mxu0 %v937_v0  ;;  %689 = vmatprep.subr.bf16.mxu1 %v937_v0 }
  0x58   :  { %670 = vmatpush3.bf16.msra.mxu0 %v754_v11  ;;  %690 = vmatpush3.bf16.msra.mxu1 %v762_v16 }
  0x59   :  { %671 = vmatprep.subr.bf16.mxu0 %v937_v0  ;;  %691 = vmatprep.subr.bf16.mxu1 %v937_v0 }
  0x5c   :  { %672 = vmatpush3.bf16.msra.mxu0 %v755_v13  ;;  %692 = vmatpush3.bf16.msra.mxu1 %v763_v17 }
  0x5d   :  { %697 = vmatprep.subr.bf16.mxu0 %v937_v0  ;;  %717 = vmatprep.subr.bf16.mxu1 %v937_v0 }
  0x5f   :  { %674 = vmatmul.mubr.bf16.vlgmr.msra.gmra.mxu0 %v103_v15 }
  0x60   :  { %713 = vmatprep.mubr.msk.bf16.mxu0 %vm938_vm0, %v937_v0  ;;  %698 = vmatpush3.bf16.msra.mxu0 %v764_v18 }
  0x61   :  { %699 = vmatprep.subr.bf16.mxu0 %v937_v0 }
  0x64   :  { %700 = vmatpush3.bf16.msra.mxu0 %v765_v19 }
  0x65   :  { %701 = vmatprep.subr.bf16.mxu0 %v937_v0 }
  0x68   :  { %702 = vmatpush3.bf16.msra.mxu0 %v766_v20 }
  0x69   :  { %703 = vmatprep.subr.bf16.mxu0 %v937_v0 }
  0x6c   :  { %704 = vmatpush3.bf16.msra.mxu0 %v767_v21 }
  0x6d   :  { %705 = vmatprep.subr.bf16.mxu0 %v937_v0 }
  0x70   :  { %706 = vmatpush3.bf16.msra.mxu0 %v768_v22 }
  0x71   :  { %707 = vmatprep.subr.bf16.mxu0 %v937_v0 }
  0x74   :  { %708 = vmatpush3.bf16.msra.mxu0 %v769_v23 }
  0x75   :  { %709 = vmatprep.subr.bf16.mxu0 %v937_v0 }
  0x78   :  { %710 = vmatpush3.bf16.msra.mxu0 %v770_v24 }
  0x79   :  { %711 = vmatprep.subr.bf16.mxu0 %v937_v0 }
  0x7c   :  { %712 = vmatpush3.bf16.msra.mxu0 %v771_v32 }
 0x11f   :  { %v209_v26 = vpop.f32.mrf.mxu0 }
 0x120   :  { %v210_v27 = vadd.f32 %v585_v25, %v209_v26 }
 0x121   :  { %v675_v28 = vpop.f32.mrf.mxu0 }
 0x122   :  { %v215_v29 = vpack.c.bf16 %v210_v27, %v210_v27 }
 0x123   :  { %v212_v30 = vpop.f32.mrf.mxu0 }
 0x124   :  { %694 = vmatmul.mubr.bf16.vlgmr.msra.gmra.mxu1 %v215_v29 }
 0x125   :  { %v676_v31 = vpop.f32.mrf.mxu0  ;;  %733 = vmatprep.mubr.msk.bf16.mxu1 %vm938_vm0, %v937_v0  ;;  %718 = vmatpush3.bf16.msra.mxu1 %v772_v33 }
 0x126   :  { %719 = vmatprep.subr.bf16.mxu1 %v937_v0 }
 0x129   :  { %720 = vmatpush3.bf16.msra.mxu1 %v773_v34 }
 0x12a   :  { %721 = vmatprep.subr.bf16.mxu1 %v937_v0 }
 0x12d   :  { %722 = vmatpush3.bf16.msra.mxu1 %v774_v35 }
 0x12e   :  { %723 = vmatprep.subr.bf16.mxu1 %v937_v0 }
 0x131   :  { %724 = vmatpush3.bf16.msra.mxu1 %v775_v36 }
 0x132   :  { %725 = vmatprep.subr.bf16.mxu1 %v937_v0 }
 0x135   :  { %726 = vmatpush3.bf16.msra.mxu1 %v776_v37 }
 0x136   :  { %727 = vmatprep.subr.bf16.mxu1 %v937_v0 }
 0x139   :  { %728 = vmatpush3.bf16.msra.mxu1 %v777_v38 }
 0x13a   :  { %729 = vmatprep.subr.bf16.mxu1 %v937_v0 }
 0x13d   :  { %730 = vmatpush3.bf16.msra.mxu1 %v778_v46 }
 0x13e   :  { %731 = vmatprep.subr.bf16.mxu1 %v937_v0 }
 0x141   :  { %732 = vmatpush3.bf16.msra.mxu1 %v779_v47 }
 0x1e4   :  { %v321_v40 = vpop.f32.mrf.mxu1 }
 0x1e5   :  { %v322_v41 = vadd.f32 %v594_v39, %v321_v40 }
 0x1e6   :  { %v695_v42 = vpop.f32.mrf.mxu1 }
 0x1e7   :  { %v328_v43 = vpack.c.bf16 %v322_v41, %v322_v41  ;;  %327 = vst [vmem:[#allocation12] sm:$0xff] %v322_v41 }
 0x1e8   :  { %v324_v44 = vpop.f32.mrf.mxu1 }
 0x1e9   :  { %714 = vmatmul.mubr.bf16.vlgmr.msra.gmra.mxu0 %v328_v43 }
 0x1ea   :  { %v696_v45 = vpop.f32.mrf.mxu1 }
 0x2a9   :  { %v434_v49 = vpop.f32.mrf.mxu0 }
 0x2aa   :  { %v435_v50 = vadd.f32 %v603_v48, %v434_v49 }
 0x2ab   :  { %v715_v51 = vpop.f32.mrf.mxu0 }
 0x2ac   :  { %v440_v52 = vmax.f32 %v435_v50, 0.0 }
 0x2ad   :  { %v437_v53 = vpop.f32.mrf.mxu0 }
 0x2ae   :  { %v441_v54 = vpack.c.bf16 %v440_v52, %v440_v52 }
 0x2af   :  { %v716_v55 = vpop.f32.mrf.mxu0 }
 0x2b0   :  { %734 = vmatmul.mubr.bf16.vlgmr.msra.gmra.mxu1 %v441_v54 }
 0x2b1   :  { %891 = shalt.err (!%p888_p1)
}
 0x2b2   :  { %573 = dma.vmem_to_hbm [thread:$0]  %s571_s20, 128, %s1091_s10, [#allocation13]   ;;  %v612_v56 = vld [vmem:[%s1089_s8] ss:$0 sm:$0xff] }
 0x2b3   :  { %s940_s25 = smov [#allocation11]  }
 0x2b4   :  { %s560_s26 = sshll.u32 %s940_s25, 4  ;;  %s561_s26 = int_to_ptr.vmem [resolvable:$true] %s560_s26 }
 0x2b5   :  { %s900_s1 = scalar_lea.vmem %s561_s26, 128  ;;  %p905_p3 = scmp.lt.s32.totalorder %s561_s26, %s561_s26 }
 0x2b6   :  { %p901_p2 = scmp.ne.s32.totalorder %s561_s26, %s900_s1  ;;  %p906_p4 = scmp.lt.s32.totalorder %s900_s1, %s900_s1 }
 0x2b8   :  { %p907_p5 = por %p906_p4, %p905_p3 }
 0x2ba   :  { %p908_p6 = pnand %p907_p5, %p901_p2 }
 0x370   :  { %v547_v57 = vpop.f32.mrf.mxu1 }
 0x371   :  { %v548_v58 = vadd.f32 %v612_v56, %v547_v57 }
 0x372   :  { %v735_v59 = vpop.f32.mrf.mxu1 }
 0x373   :  { %553 = vst [vmem:[#allocation11] sm:$0xff] %v548_v58 }
 0x374   :  { %v550_v60 = vpop.f32.mrf.mxu1 }
 0x375   :  { %911 = shalt.err (!%p908_p6)
}
 0x376   :  { %563 = dma.vmem_to_hbm [thread:$0]  %s561_s26, 128, %s1090_s9, [#allocation4]   ;;  %v736_v61 = vpop.f32.mrf.mxu1 }
 0x377   :  { %926 = dma.done.wait [#allocation4], 128  }
 0x378   :  { %927 = vsyncadd [#allocation4], 4294967168 }
 0x379   :  { %928 = dma.done.wait [#allocation13], 128  }
 0x37a   :  { %929 = vsyncadd [#allocation13], 4294967168 }
 0x37b   :  { %580 = vsyncpa [#allocation3], 1 }
 0x37c   :  { %581 = vsyncpa [#allocation6], 1 }
 0x37d   :  { %582 = vsyncpa [#allocation9], 1 }
 0x37e   :  { %583 = vsyncpa [#allocation4], 1 }
 0x37f   :  { %584 = vsyncpa [#allocation13], 1 }

</bundles_post_ra>
